<compile_context>
chip_gen: v7x
topology: tpu7x:2x2x1
jax: 0.10.0
libtpu: 0.0.40
codegen_flags: <defaults>
</compile_context>

<pallas_src>
import jax
import jax.numpy as jnp
import numpy as np
from jax.experimental import pallas as pl
from jax.experimental.pallas import tpu as pltpu

B, T, VOCAB = 16, 8, 10
NUM_FEATURES, HIDDEN, NUM_CLASSES = 16, 32, 4
N_STEPS = T - 1
BATCH_BLOCK = 8                       # fills the 8 sublanes; grid axis = B // BATCH_BLOCK
ACTIONS = [0.0, 2.0, 1.0, 2.0, 1.0, 2.0]  # len = 6


def _rnn_kernel(cw_ref, pre_ref, h0_ref, w1_ref, w23_ref, b23_ref,
                wout_ref, bout_ref, out_ref):
    # Load every (tiny) operand once; the whole recurrence then lives in vregs.
    h = h0_ref[...]                        # (BB, H)   carried hidden state
    w1 = w1_ref[...]                       # (H, H)
    w23 = w23_ref[...]                     # (H, 2H)   [W2 | 0.5*W3]
    # Hoisted bias broadcast (JAX does not CSE broadcast_in_dim inside the unroll).
    b23 = jnp.broadcast_to(b23_ref[...], (BATCH_BLOCK, 2 * HIDDEN))  # (BB, 2H)
    cw0 = cw_ref[0]                        # softmax weight of the Tanh leaf
    cw1h = cw_ref[1]                       # 0.5 * softmax weight of the Sigmoid leaf

    # TODO(synk): if bundle dump shows W1/W23 re-streamed into the systolic array
    # every step, drive the MXU explicitly (pltpu.matmul_push_rhs / acc_lhs / pop)
    # to keep the weights stationary across the 7 dependent matmul pairs.
    for t in range(N_STEPS):               # statically unrolled recurrence
        # out_layers[0] + b1 = pre[t] (token gather + Linear0 precomputed host-side).
        # out_layers[1] = ReLU(Linear1(h) + Linear0(x))     (DAG[0] == 0, i == 1 branch)
        out1 = jnp.maximum(
            jnp.dot(h, w1, preferred_element_type=jnp.float32) + pre_ref[t], 0.0)

        # Fused leaves: tz[:, :H] = tanh(Linear2(out1))                (DAG[1] == 1)
        #               tz[:, H:] = tanh(0.5*Linear3(out1)); sigmoid = 0.5*(. + 1)
        tz = jnp.tanh(
            jnp.dot(out1, w23, preferred_element_type=jnp.float32) + b23)
        # TODO(synk): nn.Dropout(p=0.2) treated as identity (eval-mode semantics).

        # h = cw0 * Tanh-leaf + cw1 * Sigmoid-leaf  (== matmul(clean_weight, ans)).
        # Both halves of tz live in one (8,128) vreg; the lane-offset slice lowers
        # to a register-level select/rotate (XLU), not a VMEM round-trip.
        h = cw0 * tz[:, :HIDDEN] + cw1h * (tz[:, HIDDEN:] + 1.0)

    # final linear_layers[-1](h)
    out_ref[...] = (jnp.dot(h, wout_ref[...], preferred_element_type=jnp.float32)
                    + bout_ref[...])


@jax.jit
def rnn_cell_forward(params, word2vec, h0, batch_input):
    batch = batch_input.shape[0]
    assert batch % BATCH_BLOCK == 0

    # clean_weight is static per network: softmax of sum_weight(actions) at the
    # leaf indices (weight[1], weight[2]); packed as [cw0, 0.5*cw1] so the
    # sigmoid->tanh rewrite folds in for free.
    actions = jnp.asarray(ACTIONS, jnp.float32)
    w_all = actions @ params["w_sum"] + params["b_sum"]                 # (3,)
    cw = jax.nn.softmax(jnp.stack([w_all[1], w_all[2]]))                # (2,)
    cw_packed = jnp.stack([cw[0], 0.5 * cw[1]])                         # (2,)

    # Precompute the token-dependent stream as plain XLA (tiny gather + matmul):
    # pre[t, b] = word2vec[batch_input[b, t+1]] @ W0 + b0 + b1
    tokens = batch_input[:, 1:].T                                       # (N_STEPS, B)
    x = word2vec[tokens]                                                # (N_STEPS, B, F)
    pre = x @ params["w0"] + (params["b0"] + params["b1"])              # (N_STEPS, B, H)

    # Weight packing (once per call; once per weight update in training):
    w23 = jnp.concatenate([params["w2"], 0.5 * params["w3"]], axis=1)   # (H, 2H)
    b23 = jnp.concatenate([params["b2"], 0.5 * params["b3"]], axis=1)   # (1, 2H)

    n_blocks = batch // BATCH_BLOCK
    smem = pl.BlockSpec(memory_space=pltpu.MemorySpace.SMEM)

    def full_spec(shape):
        return pl.BlockSpec(shape, lambda i, _s=shape: (0,) * len(_s))

    return pl.pallas_call(
        _rnn_kernel,
        out_shape=jax.ShapeDtypeStruct((batch, NUM_CLASSES), jnp.float32),
        grid=(n_blocks,),
        in_specs=[
            smem,                                                        # cw_packed
            pl.BlockSpec((N_STEPS, BATCH_BLOCK, HIDDEN), lambda i: (0, i, 0)),  # pre
            pl.BlockSpec((BATCH_BLOCK, HIDDEN), lambda i: (i, 0)),       # h0
            full_spec((HIDDEN, HIDDEN)),                                 # w1
            full_spec((HIDDEN, 2 * HIDDEN)),                             # w23
            full_spec((1, 2 * HIDDEN)),                                  # b23
            full_spec((HIDDEN, NUM_CLASSES)),                            # wout
            full_spec((1, NUM_CLASSES)),                                 # bout
        ],
        out_specs=pl.BlockSpec((BATCH_BLOCK, NUM_CLASSES), lambda i: (i, 0)),
        compiler_params=pltpu.CompilerParams(
            dimension_semantics=("parallel",)),   # both TCs on v7x; no-op on v5e/v6e
    )(cw_packed, pre, h0, params["w1"], w23, b23, params["wout"], params["bout"])


def ref_forward(params, word2vec, h0, batch_input):
    """Pure-JAX reference mirroring RNN_cell.forward (eval-mode dropout)."""
    actions = jnp.asarray(ACTIONS, jnp.float32)
    w_all = actions @ params["w_sum"] + params["b_sum"]
    cw = jax.nn.softmax(jnp.stack([w_all[1], w_all[2]]))
    h = h0
    for l in range(1, batch_input.shape[1]):
        x = word2vec[batch_input[:, l]]
        out0 = x @ params["w0"] + params["b0"]
        out1 = jax.nn.relu(h @ params["w1"] + params["b1"] + out0)
        out2 = jnp.tanh(out1 @ params["w2"] + params["b2"])
        out3 = jax.nn.sigmoid(out1 @ params["w3"] + params["b3"])
        h = cw[0] * out2 + cw[1] * out3
    return h @ params["wout"] + params["bout"]


def init_params(key):
    def linear(k, fan_in, fan_out):
        k1, k2 = jax.random.split(k)
        bound = 1.0 / np.sqrt(fan_in)
        W = jax.random.uniform(k1, (fan_in, fan_out), jnp.float32, -bound, bound)
        b = jax.random.uniform(k2, (1, fan_out), jnp.float32, -bound, bound)
        return W, b

    keys = jax.random.split(key, 6)
    p = {}
    p["w0"], p["b0"] = linear(keys[0], NUM_FEATURES, HIDDEN)
    p["w1"], p["b1"] = linear(keys[1], HIDDEN, HIDDEN)
    p["w2"], p["b2"] = linear(keys[2], HIDDEN, HIDDEN)
    p["w3"], p["b3"] = linear(keys[3], HIDDEN, HIDDEN)
    p["wout"], p["bout"] = linear(keys[4], HIDDEN, NUM_CLASSES)
    w_sum, b_sum = linear(keys[5], len(ACTIONS), 3)
    p["w_sum"], p["b_sum"] = w_sum, b_sum[0]
    return p


if __name__ == "__main__":
    key = jax.random.PRNGKey(0)
    kp, kw, kh, kb = jax.random.split(key, 4)
    params = init_params(kp)

    word2vec = jax.random.normal(kw, (VOCAB, NUM_FEATURES), jnp.float32)
    h0 = jax.random.uniform(kh, (B, HIDDEN), jnp.float32)      # h passed explicitly
    batch_input = jax.random.randint(kb, (B, T), 0, VOCAB, jnp.int32)

    out = rnn_cell_forward(params, word2vec, h0, batch_input)
    out = jax.block_until_ready(out)

    ref = ref_forward(params, word2vec, h0, batch_input)
    np.testing.assert_allclose(np.asarray(out), np.asarray(ref), rtol=1e-5, atol=1e-5)
    print("KERNEL_OK")
</pallas_src>

<mosaic_0001>
module attributes {stable_mosaic.version = 11 : i64} {
  func.func @_rnn_kernel(%arg0: i32, %arg1: memref<2xf32, #tpu.memory_space<smem>>, %arg2: memref<7x8x32xf32, #tpu.memory_space<vmem>>, %arg3: memref<8x32xf32, #tpu.memory_space<vmem>>, %arg4: memref<32x32xf32, #tpu.memory_space<vmem>>, %arg5: memref<32x64xf32, #tpu.memory_space<vmem>>, %arg6: memref<1x64xf32, #tpu.memory_space<vmem>>, %arg7: memref<32x4xf32, #tpu.memory_space<vmem>>, %arg8: memref<1x4xf32, #tpu.memory_space<vmem>>, %arg9: memref<8x4xf32, #tpu.memory_space<vmem>>) attributes {dimension_semantics = [#tpu.dimension_semantics<parallel>], iteration_bounds = array<i64: 2>, scalar_prefetch = 0 : i64, scratch_operands = 0 : i64, tpu.core_type = #tpu.core_type<tc>, window_params = [{transform_indices = @transform_0, window_bounds = array<i64: 2>}, {transform_indices = @transform_1, window_bounds = array<i64: 7, 8, 32>}, {transform_indices = @transform_2, window_bounds = array<i64: 8, 32>}, {pipeline_mode = #tpu.pipeline_mode<synchronous>, transform_indices = @transform_3, window_bounds = array<i64: 32, 32>}, {pipeline_mode = #tpu.pipeline_mode<synchronous>, transform_indices = @transform_4, window_bounds = array<i64: 32, 64>}, {pipeline_mode = #tpu.pipeline_mode<synchronous>, transform_indices = @transform_5, window_bounds = array<i64: 1, 64>}, {pipeline_mode = #tpu.pipeline_mode<synchronous>, transform_indices = @transform_6, window_bounds = array<i64: 32, 4>}, {pipeline_mode = #tpu.pipeline_mode<synchronous>, transform_indices = @transform_7, window_bounds = array<i64: 1, 4>}, {transform_indices = @transform_8, window_bounds = array<i64: 8, 4>}]} {
    %c0 = arith.constant 0 : index
    %c0_0 = arith.constant 0 : index
    %0 = vector.load %arg3[%c0, %c0_0] : memref<8x32xf32, #tpu.memory_space<vmem>>, vector<8x32xf32>
    %c0_1 = arith.constant 0 : index
    %c0_2 = arith.constant 0 : index
    %1 = vector.load %arg4[%c0_1, %c0_2] : memref<32x32xf32, #tpu.memory_space<vmem>>, vector<32x32xf32>
    %c0_3 = arith.constant 0 : index
    %c0_4 = arith.constant 0 : index
    %2 = vector.load %arg5[%c0_3, %c0_4] : memref<32x64xf32, #tpu.memory_space<vmem>>, vector<32x64xf32>
    %c0_5 = arith.constant 0 : index
    %c0_6 = arith.constant 0 : index
    %3 = vector.load %arg6[%c0_5, %c0_6] : memref<1x64xf32, #tpu.memory_space<vmem>>, vector<1x64xf32>
    %4 = vector.shape_cast %3 : vector<1x64xf32> to vector<1x64xf32>
    %5 = vector.broadcast %4 : vector<1x64xf32> to vector<8x64xf32>
    %c0_7 = arith.constant 0 : index
    %6 = memref.load %arg1[%c0_7] : memref<2xf32, #tpu.memory_space<smem>>
    %c1 = arith.constant 1 : index
    %7 = memref.load %arg1[%c1] : memref<2xf32, #tpu.memory_space<smem>>
    %cst = arith.constant dense<0.000000e+00> : vector<8x32xf32>
    %8 = tpu.matmul %0, %1, %cst {dimension_numbers = #tpu.dot_dimension_numbers<[1], [0], [0], [1], [0, 0, 1, 1], [], []>} : vector<8x32xf32>, vector<32x32xf32>, vector<8x32xf32> -> vector<8x32xf32>
    %c0_8 = arith.constant 0 : index
    %c0_9 = arith.constant 0 : index
    %c0_10 = arith.constant 0 : index
    %9 = vector.load %arg2[%c0_8, %c0_9, %c0_10] : memref<7x8x32xf32, #tpu.memory_space<vmem>>, vector<1x8x32xf32>
    %10 = vector.shape_cast %9 : vector<1x8x32xf32> to vector<8x32xf32>
    %11 = arith.addf %8, %10 : vector<8x32xf32>
    %cst_11 = arith.constant 0.000000e+00 : f32
    %12 = vector.broadcast %cst_11 : f32 to vector<8x32xf32>
    %13 = arith.maximumf %11, %12 : vector<8x32xf32>
    %cst_12 = arith.constant dense<0.000000e+00> : vector<8x64xf32>
    %14 = tpu.matmul %13, %2, %cst_12 {dimension_numbers = #tpu.dot_dimension_numbers<[1], [0], [0], [1], [0, 0, 1, 1], [], []>} : vector<8x32xf32>, vector<32x64xf32>, vector<8x64xf32> -> vector<8x64xf32>
    %15 = arith.addf %14, %5 : vector<8x64xf32>
    %16 = math.tanh %15 : vector<8x64xf32>
    %17 = vector.extract_strided_slice %16 {offsets = [0, 0], sizes = [8, 32], strides = [1, 1]} : vector<8x64xf32> to vector<8x32xf32>
    %18 = vector.broadcast %6 : f32 to vector<8x32xf32>
    %19 = arith.mulf %18, %17 : vector<8x32xf32>
    %20 = vector.extract_strided_slice %16 {offsets = [0, 32], sizes = [8, 32], strides = [1, 1]} : vector<8x64xf32> to vector<8x32xf32>
    %cst_13 = arith.constant 1.000000e+00 : f32
    %21 = vector.broadcast %cst_13 : f32 to vector<8x32xf32>
    %22 = arith.addf %20, %21 : vector<8x32xf32>
    %23 = vector.broadcast %7 : f32 to vector<8x32xf32>
    %24 = arith.mulf %23, %22 : vector<8x32xf32>
    %25 = arith.addf %19, %24 : vector<8x32xf32>
    %cst_14 = arith.constant dense<0.000000e+00> : vector<8x32xf32>
    %26 = tpu.matmul %25, %1, %cst_14 {dimension_numbers = #tpu.dot_dimension_numbers<[1], [0], [0], [1], [0, 0, 1, 1], [], []>} : vector<8x32xf32>, vector<32x32xf32>, vector<8x32xf32> -> vector<8x32xf32>
    %c1_15 = arith.constant 1 : index
    %c0_16 = arith.constant 0 : index
    %c0_17 = arith.constant 0 : index
    %27 = vector.load %arg2[%c1_15, %c0_16, %c0_17] : memref<7x8x32xf32, #tpu.memory_space<vmem>>, vector<1x8x32xf32>
    %28 = vector.shape_cast %27 : vector<1x8x32xf32> to vector<8x32xf32>
    %29 = arith.addf %26, %28 : vector<8x32xf32>
    %cst_18 = arith.constant 0.000000e+00 : f32
    %30 = vector.broadcast %cst_18 : f32 to vector<8x32xf32>
    %31 = arith.maximumf %29, %30 : vector<8x32xf32>
    %cst_19 = arith.constant dense<0.000000e+00> : vector<8x64xf32>
    %32 = tpu.matmul %31, %2, %cst_19 {dimension_numbers = #tpu.dot_dimension_numbers<[1], [0], [0], [1], [0, 0, 1, 1], [], []>} : vector<8x32xf32>, vector<32x64xf32>, vector<8x64xf32> -> vector<8x64xf32>
    %33 = arith.addf %32, %5 : vector<8x64xf32>
    %34 = math.tanh %33 : vector<8x64xf32>
    %35 = vector.extract_strided_slice %34 {offsets = [0, 0], sizes = [8, 32], strides = [1, 1]} : vector<8x64xf32> to vector<8x32xf32>
    %36 = vector.broadcast %6 : f32 to vector<8x32xf32>
    %37 = arith.mulf %36, %35 : vector<8x32xf32>
    %38 = vector.extract_strided_slice %34 {offsets = [0, 32], sizes = [8, 32], strides = [1, 1]} : vector<8x64xf32> to vector<8x32xf32>
    %cst_20 = arith.constant 1.000000e+00 : f32
    %39 = vector.broadcast %cst_20 : f32 to vector<8x32xf32>
    %40 = arith.addf %38, %39 : vector<8x32xf32>
    %41 = vector.broadcast %7 : f32 to vector<8x32xf32>
    %42 = arith.mulf %41, %40 : vector<8x32xf32>
    %43 = arith.addf %37, %42 : vector<8x32xf32>
    %cst_21 = arith.constant dense<0.000000e+00> : vector<8x32xf32>
    %44 = tpu.matmul %43, %1, %cst_21 {dimension_numbers = #tpu.dot_dimension_numbers<[1], [0], [0], [1], [0, 0, 1, 1], [], []>} : vector<8x32xf32>, vector<32x32xf32>, vector<8x32xf32> -> vector<8x32xf32>
    %c2 = arith.constant 2 : index
    %c0_22 = arith.constant 0 : index
    %c0_23 = arith.constant 0 : index
    %45 = vector.load %arg2[%c2, %c0_22, %c0_23] : memref<7x8x32xf32, #tpu.memory_space<vmem>>, vector<1x8x32xf32>
    %46 = vector.shape_cast %45 : vector<1x8x32xf32> to vector<8x32xf32>
    %47 = arith.addf %44, %46 : vector<8x32xf32>
    %cst_24 = arith.constant 0.000000e+00 : f32
    %48 = vector.broadcast %cst_24 : f32 to vector<8x32xf32>
    %49 = arith.maximumf %47, %48 : vector<8x32xf32>
    %cst_25 = arith.constant dense<0.000000e+00> : vector<8x64xf32>
    %50 = tpu.matmul %49, %2, %cst_25 {dimension_numbers = #tpu.dot_dimension_numbers<[1], [0], [0], [1], [0, 0, 1, 1], [], []>} : vector<8x32xf32>, vector<32x64xf32>, vector<8x64xf32> -> vector<8x64xf32>
    %51 = arith.addf %50, %5 : vector<8x64xf32>
    %52 = math.tanh %51 : vector<8x64xf32>
    %53 = vector.extract_strided_slice %52 {offsets = [0, 0], sizes = [8, 32], strides = [1, 1]} : vector<8x64xf32> to vector<8x32xf32>
    %54 = vector.broadcast %6 : f32 to vector<8x32xf32>
    %55 = arith.mulf %54, %53 : vector<8x32xf32>
    %56 = vector.extract_strided_slice %52 {offsets = [0, 32], sizes = [8, 32], strides = [1, 1]} : vector<8x64xf32> to vector<8x32xf32>
    %cst_26 = arith.constant 1.000000e+00 : f32
    %57 = vector.broadcast %cst_26 : f32 to vector<8x32xf32>
    %58 = arith.addf %56, %57 : vector<8x32xf32>
    %59 = vector.broadcast %7 : f32 to vector<8x32xf32>
    %60 = arith.mulf %59, %58 : vector<8x32xf32>
    %61 = arith.addf %55, %60 : vector<8x32xf32>
    %cst_27 = arith.constant dense<0.000000e+00> : vector<8x32xf32>
    %62 = tpu.matmul %61, %1, %cst_27 {dimension_numbers = #tpu.dot_dimension_numbers<[1], [0], [0], [1], [0, 0, 1, 1], [], []>} : vector<8x32xf32>, vector<32x32xf32>, vector<8x32xf32> -> vector<8x32xf32>
    %c3 = arith.constant 3 : index
    %c0_28 = arith.constant 0 : index
    %c0_29 = arith.constant 0 : index
    %63 = vector.load %arg2[%c3, %c0_28, %c0_29] : memref<7x8x32xf32, #tpu.memory_space<vmem>>, vector<1x8x32xf32>
    %64 = vector.shape_cast %63 : vector<1x8x32xf32> to vector<8x32xf32>
    %65 = arith.addf %62, %64 : vector<8x32xf32>
    %cst_30 = arith.constant 0.000000e+00 : f32
    %66 = vector.broadcast %cst_30 : f32 to vector<8x32xf32>
    %67 = arith.maximumf %65, %66 : vector<8x32xf32>
    %cst_31 = arith.constant dense<0.000000e+00> : vector<8x64xf32>
    %68 = tpu.matmul %67, %2, %cst_31 {dimension_numbers = #tpu.dot_dimension_numbers<[1], [0], [0], [1], [0, 0, 1, 1], [], []>} : vector<8x32xf32>, vector<32x64xf32>, vector<8x64xf32> -> vector<8x64xf32>
    %69 = arith.addf %68, %5 : vector<8x64xf32>
    %70 = math.tanh %69 : vector<8x64xf32>
    %71 = vector.extract_strided_slice %70 {offsets = [0, 0], sizes = [8, 32], strides = [1, 1]} : vector<8x64xf32> to vector<8x32xf32>
    %72 = vector.broadcast %6 : f32 to vector<8x32xf32>
    %73 = arith.mulf %72, %71 : vector<8x32xf32>
    %74 = vector.extract_strided_slice %70 {offsets = [0, 32], sizes = [8, 32], strides = [1, 1]} : vector<8x64xf32> to vector<8x32xf32>
    %cst_32 = arith.constant 1.000000e+00 : f32
    %75 = vector.broadcast %cst_32 : f32 to vector<8x32xf32>
    %76 = arith.addf %74, %75 : vector<8x32xf32>
    %77 = vector.broadcast %7 : f32 to vector<8x32xf32>
    %78 = arith.mulf %77, %76 : vector<8x32xf32>
    %79 = arith.addf %73, %78 : vector<8x32xf32>
    %cst_33 = arith.constant dense<0.000000e+00> : vector<8x32xf32>
    %80 = tpu.matmul %79, %1, %cst_33 {dimension_numbers = #tpu.dot_dimension_numbers<[1], [0], [0], [1], [0, 0, 1, 1], [], []>} : vector<8x32xf32>, vector<32x32xf32>, vector<8x32xf32> -> vector<8x32xf32>
    %c4 = arith.constant 4 : index
    %c0_34 = arith.constant 0 : index
    %c0_35 = arith.constant 0 : index
    %81 = vector.load %arg2[%c4, %c0_34, %c0_35] : memref<7x8x32xf32, #tpu.memory_space<vmem>>, vector<1x8x32xf32>
    %82 = vector.shape_cast %81 : vector<1x8x32xf32> to vector<8x32xf32>
    %83 = arith.addf %80, %82 : vector<8x32xf32>
    %cst_36 = arith.constant 0.000000e+00 : f32
    %84 = vector.broadcast %cst_36 : f32 to vector<8x32xf32>
    %85 = arith.maximumf %83, %84 : vector<8x32xf32>
    %cst_37 = arith.constant dense<0.000000e+00> : vector<8x64xf32>
    %86 = tpu.matmul %85, %2, %cst_37 {dimension_numbers = #tpu.dot_dimension_numbers<[1], [0], [0], [1], [0, 0, 1, 1], [], []>} : vector<8x32xf32>, vector<32x64xf32>, vector<8x64xf32> -> vector<8x64xf32>
    %87 = arith.addf %86, %5 : vector<8x64xf32>
    %88 = math.tanh %87 : vector<8x64xf32>
    %89 = vector.extract_strided_slice %88 {offsets = [0, 0], sizes = [8, 32], strides = [1, 1]} : vector<8x64xf32> to vector<8x32xf32>
    %90 = vector.broadcast %6 : f32 to vector<8x32xf32>
    %91 = arith.mulf %90, %89 : vector<8x32xf32>
    %92 = vector.extract_strided_slice %88 {offsets = [0, 32], sizes = [8, 32], strides = [1, 1]} : vector<8x64xf32> to vector<8x32xf32>
    %cst_38 = arith.constant 1.000000e+00 : f32
    %93 = vector.broadcast %cst_38 : f32 to vector<8x32xf32>
    %94 = arith.addf %92, %93 : vector<8x32xf32>
    %95 = vector.broadcast %7 : f32 to vector<8x32xf32>
    %96 = arith.mulf %95, %94 : vector<8x32xf32>
    %97 = arith.addf %91, %96 : vector<8x32xf32>
    %cst_39 = arith.constant dense<0.000000e+00> : vector<8x32xf32>
    %98 = tpu.matmul %97, %1, %cst_39 {dimension_numbers = #tpu.dot_dimension_numbers<[1], [0], [0], [1], [0, 0, 1, 1], [], []>} : vector<8x32xf32>, vector<32x32xf32>, vector<8x32xf32> -> vector<8x32xf32>
    %c5 = arith.constant 5 : index
    %c0_40 = arith.constant 0 : index
    %c0_41 = arith.constant 0 : index
    %99 = vector.load %arg2[%c5, %c0_40, %c0_41] : memref<7x8x32xf32, #tpu.memory_space<vmem>>, vector<1x8x32xf32>
    %100 = vector.shape_cast %99 : vector<1x8x32xf32> to vector<8x32xf32>
    %101 = arith.addf %98, %100 : vector<8x32xf32>
    %cst_42 = arith.constant 0.000000e+00 : f32
    %102 = vector.broadcast %cst_42 : f32 to vector<8x32xf32>
    %103 = arith.maximumf %101, %102 : vector<8x32xf32>
    %cst_43 = arith.constant dense<0.000000e+00> : vector<8x64xf32>
    %104 = tpu.matmul %103, %2, %cst_43 {dimension_numbers = #tpu.dot_dimension_numbers<[1], [0], [0], [1], [0, 0, 1, 1], [], []>} : vector<8x32xf32>, vector<32x64xf32>, vector<8x64xf32> -> vector<8x64xf32>
    %105 = arith.addf %104, %5 : vector<8x64xf32>
    %106 = math.tanh %105 : vector<8x64xf32>
    %107 = vector.extract_strided_slice %106 {offsets = [0, 0], sizes = [8, 32], strides = [1, 1]} : vector<8x64xf32> to vector<8x32xf32>
    %108 = vector.broadcast %6 : f32 to vector<8x32xf32>
    %109 = arith.mulf %108, %107 : vector<8x32xf32>
    %110 = vector.extract_strided_slice %106 {offsets = [0, 32], sizes = [8, 32], strides = [1, 1]} : vector<8x64xf32> to vector<8x32xf32>
    %cst_44 = arith.constant 1.000000e+00 : f32
    %111 = vector.broadcast %cst_44 : f32 to vector<8x32xf32>
    %112 = arith.addf %110, %111 : vector<8x32xf32>
    %113 = vector.broadcast %7 : f32 to vector<8x32xf32>
    %114 = arith.mulf %113, %112 : vector<8x32xf32>
    %115 = arith.addf %109, %114 : vector<8x32xf32>
    %cst_45 = arith.constant dense<0.000000e+00> : vector<8x32xf32>
    %116 = tpu.matmul %115, %1, %cst_45 {dimension_numbers = #tpu.dot_dimension_numbers<[1], [0], [0], [1], [0, 0, 1, 1], [], []>} : vector<8x32xf32>, vector<32x32xf32>, vector<8x32xf32> -> vector<8x32xf32>
    %c6 = arith.constant 6 : index
    %c0_46 = arith.constant 0 : index
    %c0_47 = arith.constant 0 : index
    %117 = vector.load %arg2[%c6, %c0_46, %c0_47] : memref<7x8x32xf32, #tpu.memory_space<vmem>>, vector<1x8x32xf32>
    %118 = vector.shape_cast %117 : vector<1x8x32xf32> to vector<8x32xf32>
    %119 = arith.addf %116, %118 : vector<8x32xf32>
    %cst_48 = arith.constant 0.000000e+00 : f32
    %120 = vector.broadcast %cst_48 : f32 to vector<8x32xf32>
    %121 = arith.maximumf %119, %120 : vector<8x32xf32>
    %cst_49 = arith.constant dense<0.000000e+00> : vector<8x64xf32>
    %122 = tpu.matmul %121, %2, %cst_49 {dimension_numbers = #tpu.dot_dimension_numbers<[1], [0], [0], [1], [0, 0, 1, 1], [], []>} : vector<8x32xf32>, vector<32x64xf32>, vector<8x64xf32> -> vector<8x64xf32>
    %123 = arith.addf %122, %5 : vector<8x64xf32>
    %124 = math.tanh %123 : vector<8x64xf32>
    %125 = vector.extract_strided_slice %124 {offsets = [0, 0], sizes = [8, 32], strides = [1, 1]} : vector<8x64xf32> to vector<8x32xf32>
    %126 = vector.broadcast %6 : f32 to vector<8x32xf32>
    %127 = arith.mulf %126, %125 : vector<8x32xf32>
    %128 = vector.extract_strided_slice %124 {offsets = [0, 32], sizes = [8, 32], strides = [1, 1]} : vector<8x64xf32> to vector<8x32xf32>
    %cst_50 = arith.constant 1.000000e+00 : f32
    %129 = vector.broadcast %cst_50 : f32 to vector<8x32xf32>
    %130 = arith.addf %128, %129 : vector<8x32xf32>
    %131 = vector.broadcast %7 : f32 to vector<8x32xf32>
    %132 = arith.mulf %131, %130 : vector<8x32xf32>
    %133 = arith.addf %127, %132 : vector<8x32xf32>
    %c0_51 = arith.constant 0 : index
    %c0_52 = arith.constant 0 : index
    %134 = vector.load %arg7[%c0_51, %c0_52] : memref<32x4xf32, #tpu.memory_space<vmem>>, vector<32x4xf32>
    %cst_53 = arith.constant dense<0.000000e+00> : vector<8x4xf32>
    %135 = tpu.matmul %133, %134, %cst_53 {dimension_numbers = #tpu.dot_dimension_numbers<[1], [0], [0], [1], [0, 0, 1, 1], [], []>} : vector<8x32xf32>, vector<32x4xf32>, vector<8x4xf32> -> vector<8x4xf32>
    %c0_54 = arith.constant 0 : index
    %c0_55 = arith.constant 0 : index
    %136 = vector.load %arg8[%c0_54, %c0_55] : memref<1x4xf32, #tpu.memory_space<vmem>>, vector<1x4xf32>
    %137 = vector.broadcast %136 : vector<1x4xf32> to vector<8x4xf32>
    %138 = arith.addf %135, %137 : vector<8x4xf32>
    %c0_56 = arith.constant 0 : index
    %c0_57 = arith.constant 0 : index
    %139 = vector.load %arg9[%c0_56, %c0_57] : memref<8x4xf32, #tpu.memory_space<vmem>>, vector<8x4xf32>
    tpu.vector_store %arg9[%c0_56, %c0_57], %138 {strides = array<i32>} : memref<8x4xf32, #tpu.memory_space<vmem>>, vector<8x4xf32>,
    return
  }
  func.func @transform_0(%arg0: i32) -> i32 {
    %c0_i32 = arith.constant 0 : i32
    %c0_i32_0 = arith.constant 0 : i32
    return %c0_i32 : i32
  }
  func.func @transform_1(%arg0: i32) -> (i32, i32, i32) {
    %c0_i32 = arith.constant 0 : i32
    %c0_i32_0 = arith.constant 0 : i32
    %c0_i32_1 = arith.constant 0 : i32
    return %c0_i32, %arg0, %c0_i32_0 : i32, i32, i32
  }
  func.func @transform_2(%arg0: i32) -> (i32, i32) {
    %c0_i32 = arith.constant 0 : i32
    %c0_i32_0 = arith.constant 0 : i32
    return %arg0, %c0_i32 : i32, i32
  }
  func.func @transform_3(%arg0: i32) -> (i32, i32) {
    %c0_i32 = arith.constant 0 : i32
    %c0_i32_0 = arith.constant 0 : i32
    %c0_i32_1 = arith.constant 0 : i32
    return %c0_i32, %c0_i32_0 : i32, i32
  }
  func.func @transform_4(%arg0: i32) -> (i32, i32) {
    %c0_i32 = arith.constant 0 : i32
    %c0_i32_0 = arith.constant 0 : i32
    %c0_i32_1 = arith.constant 0 : i32
    return %c0_i32, %c0_i32_0 : i32, i32
  }
  func.func @transform_5(%arg0: i32) -> (i32, i32) {
    %c0_i32 = arith.constant 0 : i32
    %c0_i32_0 = arith.constant 0 : i32
    %c0_i32_1 = arith.constant 0 : i32
    return %c0_i32, %c0_i32_0 : i32, i32
  }
  func.func @transform_6(%arg0: i32) -> (i32, i32) {
    %c0_i32 = arith.constant 0 : i32
    %c0_i32_0 = arith.constant 0 : i32
    %c0_i32_1 = arith.constant 0 : i32
    return %c0_i32, %c0_i32_0 : i32, i32
  }
  func.func @transform_7(%arg0: i32) -> (i32, i32) {
    %c0_i32 = arith.constant 0 : i32
    %c0_i32_0 = arith.constant 0 : i32
    %c0_i32_1 = arith.constant 0 : i32
    return %c0_i32, %c0_i32_0 : i32, i32
  }
  func.func @transform_8(%arg0: i32) -> (i32, i32) {
    %c0_i32 = arith.constant 0 : i32
    %c0_i32_0 = arith.constant 0 : i32
    return %arg0, %c0_i32 : i32, i32
  }
}

</mosaic_0001>

<bundles_post_ra>
// kernel: rnn_cell_forward.1
= control target key start
LH: loop header
LB: loop body
LE: loop exit
PB: predicated region body
PF: predicated region fallthrough
CT: control target
= control target key end

     0   :  { %13 = vsyncpa [#allocation3], 0  ;;  %s2202_s27 = smov 0   ;;  %s2204_s28 = smov 0   ;;  %s2486_s0 = inlined_call_operand.vmem [shape: f32[2], index: 0, kind: input, shape index: {}]   ;;  %s2487_s1 = inlined_call_operand.vmem [shape: f32[7,16,32], index: 1, kind: input, shape index: {}]   ;;  %s2488_s2 = inlined_call_operand.vmem [shape: f32[16,32], index: 2, kind: input, shape index: {}]   ;;  %s2489_s3 = inlined_call_operand.vmem [shape: f32[32,32], index: 3, kind: input, shape index: {}]   ;;  %s2490_s4 = inlined_call_operand.vmem [shape: f32[32,64], index: 4, kind: input, shape index: {}]   ;;  %s2491_s5 = inlined_call_operand.vmem [shape: f32[1,64], index: 5, kind: input, shape index: {}]   ;;  %s2492_s6 = inlined_call_operand.vmem [shape: f32[32,4], index: 6, kind: input, shape index: {}]   ;;  %s2493_s7 = inlined_call_operand.vmem [shape: f32[1,4], index: 7, kind: input, shape index: {}]   ;;  %s2494_s8 = inlined_call_operand.vmem [shape: f32[16,4], index: 8, kind: output, shape index: {}]  }
   0x1   :  { %s2206_s29 = smov 0  }
   0x2 LB: > { %s2218_s30 = sadd.s32 4294967295, %s2150_s29   ;;  %s2221_s9 = sadd.s32 1, %s2150_s29   ;;  %s2150_s29 = sphi %s2206_s29, %s2499_s29   ;;  %s2146_s28 = sphi %s2204_s28, %s2498_s28   ;;  %s2142_s27 = sphi %s2202_s27, %s2497_s27  }
   0x3   : > { %s44_s10 = ssub.s32 %s2150_s29, %s2221_s9  ;;  %s47_s11 = sadd.s32 1, %s2146_s28 }
   0x4   : > { %p45_p0 = scmp.eq.s32.totalorder %s44_s10, 0  ;;  %p54_p1 = scmp.ne.s32.totalorder %s2146_s28, %s2142_s27 }
   0x5   : > { %p55_p2 = scmp.eq.s32.totalorder %s2150_s29, 0  ;;  %p1690_p3 = scmp.ge.s32.totalorder %s2150_s29, 1 }
   0x6   : > { %s2231_s12 = scalar_select %p45_p0, %s2146_s28, %s47_s11  }
   0x7   : > { %p2233_p4 = por %p55_p2, %p54_p1  ;;  %p228_p5 = scmp.lt.s32.totalorder %s2150_s29, 3 }
   0x8   : > { %p2064_p6 = scmp.eq.s32.totalorder %s2218_s30, 0  ;;  %s241_s17 = sshll.u32 %s2486_s0, 4  ;;  %s242_s17 = int_to_ptr.vmem [resolvable:$true] %s241_s17 }
   0x9   : > { %p2239_p7 = pnand %p1690_p3, %p228_p5  ;;  %s2109_s18 = scalar_lea.vmem %s242_s17, 16 }
   0xa   : > { %p2110_p10 = scmp.ne.s32.totalorder %s242_s17, %s2109_s18  ;;  %p2117_p0 = scmp.lt.s32.totalorder %s242_s17, %s242_s17 }
   0xb   : > { %p2060_p8 = pneg %p2239_p7  ;;  %p2118_p1 = scmp.lt.s32.totalorder %s2109_s18, %s2109_s18 }
   0xd   : > { %p2061_p9 = pnand %p2064_p6, %p2060_p8  ;;  %p2119_p2 = por %p2118_p1, %p2117_p0 }
   0xf   : > { %p2111_p11 = pneg %p2061_p9 }
  0x11   : > { %p2112_p12 = pnand %p2111_p11, %p2110_p10 }
  0x13   : > { %p2113_p13 = pneg %p2112_p12 }
  0x15   : > { %p2120_p3 = pnand %p2119_p2, %p2113_p13 }
  0x17   : > { %2123 = shalt.err (!%p2120_p3)
}
  0x18   : > { %s2152_s19 = smov [#allocation2]   ;;  %p1692_p5 = scmp.ge.s32.totalorder %s2150_s29, 2 }
  0x19   : > { %2063 = dma.vmem_to_smem (!%p2061_p9), %s242_s17, 16, %s2152_s19, [#allocation3]  }
  0x1a   : > { %263 = sbr.rel (%p1692_p5) target bundleno = 41 (0x29), region = 40 }
  0x21   : > { %266 = sbr.rel (!%p2233_p4) target bundleno = 41 (0x29), region = 44  ;;  %s268_s20 = sand.u32 (%p2233_p4), 1, %s2146_s28  }
  0x22   : > { %s1693_s21 = sshll.u32 (%p2233_p4), %s2150_s29, 3  ;;  %s2054_s22 = smul.u32 (%p2233_p4), 56, %s268_s20 }
  0x23   : > { %s272_s25 = scalar_lea.vmem (%p2233_p4), %s2487_s1, %s1693_s21 }
  0x24   : > { %v312_v0 = vld [vmem:[%s272_s25] sm:$0xff] (%p2233_p4)  ;;  %v314_v1 = vld [vmem:[%s272_s25 + $0x10] sm:$0xff] (%p2233_p4)  ;;  %s270_s26 = scalar_lea.vmem (%p2233_p4), [#allocation4], %s2054_s22 }
  0x25   : > { %v316_v2 = vld [vmem:[%s272_s25 + $0x20] sm:$0xff] (%p2233_p4)  ;;  %v318_v3 = vld [vmem:[%s272_s25 + $0x30] sm:$0xff] (%p2233_p4)  ;;  %313 = vst [vmem:[%s270_s26] sm:$0xff] (%p2233_p4), %v312_v0  ;;  %315 = vst [vmem:[%s270_s26 + $0x8] sm:$0xff] (%p2233_p4), %v314_v1 }
  0x26   : > { %v320_v4 = vld [vmem:[%s272_s25 + $0x40] sm:$0xff] (%p2233_p4)  ;;  %v322_v5 = vld [vmem:[%s272_s25 + $0x50] sm:$0xff] (%p2233_p4)  ;;  %317 = vst [vmem:[%s270_s26 + $0x10] sm:$0xff] (%p2233_p4), %v316_v2  ;;  %319 = vst [vmem:[%s270_s26 + $0x18] sm:$0xff] (%p2233_p4), %v318_v3 }
  0x27   : > { %321 = vst [vmem:[%s270_s26 + $0x20] sm:$0xff] (%p2233_p4), %v320_v4  ;;  %323 = vst [vmem:[%s270_s26 + $0x28] sm:$0xff] (%p2233_p4), %v322_v5  ;;  %v324_v6 = vld [vmem:[%s272_s25 + $0x60] sm:$0xff] (%p2233_p4) }
  0x28   : > { %325 = vst [vmem:[%s270_s26 + $0x30] sm:$0xff] %v324_v6 }
  0x29 PF: > { %341 = sbr.rel (%p2239_p7) target bundleno = 4213 (0x1075), region = 86 }
  0x30   : > { %2137 = dma.done.wait (%p2064_p6), [#allocation3], 16  }
  0x31   : > { %2139 = vsyncadd (%p2064_p6), [#allocation3], 4294967280  ;;  %s348_s29 = sand.u32 1, %s2142_s27  }
  0x32   : > { %s2055_s10 = smul.u32 56, %s348_s29 }
  0x34   : > { %s2265_s11 = scalar_lea.vmem [#allocation4], %s2055_s10 }
  0x35   : > { %354 = sfence }
  0x36   : > { %v394_v7 = vld [vmem:[%s2489_s3] sm:$0xff]  ;;  %v395_v8 = vld [vmem:[%s2489_s3 + $0x8] sm:$0xff]  ;;  %v396_v9 = vld [vmem:[%s2489_s3 + $0x10] sm:$0xff]  ;;  %v2153_v10 = vmov 0.0|0.0   ;;  %vm2154_vm0 = vmmov 0   ;;  %v2155_v13 = vmov 0.0  }
  0x37   : > { %1964 = vmatprep.subr.bf16.mxu0 %v2153_v10  ;;  %v2277_v11 = vpack.c.bf16 %v395_v8, %v394_v7  ;;  %v397_v12 = vld [vmem:[%s2489_s3 + $0x18] sm:$0xff]  ;;  %1807 = vmatprep.mubr.msk.f32.mxu0 %vm2154_vm0, %v2155_v13  ;;  %p385_p4 = scmp.lt.s32.totalorder %s2218_s30, 1  ;;  %v398_v14 = vld [vmem:[%s2490_s4] sm:$0xff]  ;;  %v399_v15 = vld [vmem:[%s2490_s4 + $0x8] sm:$0xff]  ;;  %vm412_vm1 = vcmask 261120   ;;  %s1699_s18 = sld [smem:[#allocation2 + $0x1]] }
  0x38   : > { %1970 = vmatprep.subr.bf16.mxu1 %v2153_v10  ;;  %v2292_v16 = vpack.c.bf16 %v399_v15, %v398_v14  ;;  %1818 = vmatprep.mubr.msk.f32.mxu1 %vm2154_vm0, %v2155_v13  ;;  %v2297_v17 = vpack.c.bf16 %v397_v12, %v396_v9  ;;  %v400_v19 = vld [vmem:[%s2490_s4 + $0x10] sm:$0xff]  ;;  %v401_v20 = vld [vmem:[%s2490_s4 + $0x18] sm:$0xff]  ;;  %v2341_v27 = vld [vmem:[%s2491_s5] ss:$0 sm:$0xff]  ;;  %s2156_s27 = smov 96   ;;  %s409_s19 = sld [smem:[#allocation2]] }
  0x39   : > { %1966 = vmatpush3.bf16.msra.mxu0 %v2277_v11  ;;  %s2501_s30 = smov (!%p385_p4, %s2218_s30), 1  ;;  %v2326_v21 = vpack.c.bf16 %v401_v20, %v400_v19  ;;  %v411_v22 = vld [vmem:[%s2265_s11] sm:$0xff]  ;;  %v1702_v39 = vld [vmem:[%s2265_s11 + $0x8] sm:$0xff]  ;;  %v1705_v53 = vld [vmem:[%s2265_s11 + $0x10] sm:$0xff]  ;;  %vm1603_vm2 = vcmask 31744  }
  0x3a   : > { %1967 = vmatprep.subr.bf16.mxu0 %v2153_v10  ;;  %1972 = vmatpush3.bf16.msra.mxu1 %v2292_v16  ;;  %s1696_s24 = sshll.u32 %s2501_s30, 3  ;;  %v1708_v3 = vld [vmem:[%s2265_s11 + $0x18] sm:$0xff] }
  0x3b   : > { %1973 = vmatprep.subr.bf16.mxu1 %v2153_v10  ;;  %s388_s29 = scalar_lea.vmem %s2488_s2, %s1696_s24  ;;  %s392_s14 = scalar_lea.vmem %s2494_s8, %s1696_s24 }
  0x3c   : > { %v393_v18 = vld [vmem:[%s388_s29] sm:$0xff] }
  0x3d   : > { %1969 = vmatpush3.bf16.msra.mxu0 %v2297_v17  ;;  %v2344_v32 = vstv %s1699_s18 }
  0x3e   : > { %1976 = vmatprep.subr.bf16.mxu0 %v2153_v10  ;;  %1975 = vmatpush3.bf16.msra.mxu1 %v2326_v21  ;;  %v2348_v35 = vstv %s409_s19 }
  0x3f   : > { %1982 = vmatprep.subr.bf16.mxu1 %v2153_v10 }
  0x40   : > { %1808 = vmatmul.mubr.msk.f32.vlgmr.msra.gmra.mrb[0].mxu0 %vm412_vm1, %v393_v18 }
  0x41   : > { %1978 = vmatpush3.bf16.msra.mxu0 %v2277_v11  ;;  %1829 = vmatprep.mubr.msk.f32.mxu0 %vm2154_vm0, %v2155_v13 }
  0x42   : > { %1979 = vmatprep.subr.bf16.mxu0 %v2153_v10 }
  0x45   : > { %1981 = vmatpush3.bf16.msra.mxu0 %v2297_v17 }
  0x46   : > { %1988 = vmatprep.subr.bf16.mxu0 %v2153_v10 }
 0x113   : > { %v482_v23 = vpop.f32.mrb[0].mxu0 }
 0x114   : > { %v483_v24 = vadd.f32 %v482_v23, %v411_v22  ;;  %v1809_v25 = vpop.f32.mrb[1].mxu0  ;;  %v1711_v23 = vld [vmem:[%s2265_s11 + $0x20] sm:$0xff] }
 0x116   : > { %v486_v26 = vmax.f32 %v483_v24, 0.0 }
 0x118   : > { %1819 = vmatmul.mubr.msk.f32.vlgmr.msra.gmra.mrb[0].mxu1 %vm412_vm1, %v486_v26 }
 0x119   : > { %1984 = vmatpush3.bf16.msra.mxu1 %v2292_v16  ;;  %1840 = vmatprep.mubr.msk.f32.mxu1 %vm2154_vm0, %v2155_v13 }
 0x11a   : > { %1985 = vmatprep.subr.bf16.mxu1 %v2153_v10 }
 0x11d   : > { %1987 = vmatpush3.bf16.msra.mxu1 %v2326_v21 }
 0x11e   : > { %1994 = vmatprep.subr.bf16.mxu1 %v2153_v10 }
 0x1eb   : > { %v556_v28 = vpop.f32.mrb[0].mxu1 }
 0x1ec   : > { %v557_v29 = vadd.f32 %v2341_v27, %v556_v28  ;;  %v1820_v30 = vpop.f32.mrb[1].mxu1 }
 0x1ee   : > { %2095 = vtanh.f32 %v557_v29 }
 0x1f8   : > { %v2096_v31 = vpop.eup %2095 }
 0x1f9   : > { %v563_v33 = vadd.f32 1.0, %v2096_v31  ;;  %v562_v36 = vmul.f32 %v2096_v31, %v2348_v35 }
 0x1fb   : > { %v565_v34 = vmul.f32 %v2344_v32, %v563_v33 }
 0x1fd   : > { %567 = vrot.lane.b32.xlu0 %v565_v34, %s2156_s27 }
 0x26f   : > { %v568_v37 = vpop.permute.xlu0 %567 }
 0x270   : > { %v570_v38 = vadd.f32 %v568_v37, %v562_v36 }
 0x272   : > { %1830 = vmatmul.mubr.msk.f32.vlgmr.msra.gmra.mrb[2].mxu0 %vm412_vm1, %v570_v38 }
 0x273   : > { %1990 = vmatpush3.bf16.msra.mxu0 %v2277_v11  ;;  %1851 = vmatprep.mubr.msk.f32.mxu0 %vm2154_vm0, %v2155_v13 }
 0x274   : > { %1991 = vmatprep.subr.bf16.mxu0 %v2153_v10 }
 0x277   : > { %1993 = vmatpush3.bf16.msra.mxu0 %v2297_v17 }
 0x278   : > { %2000 = vmatprep.subr.bf16.mxu0 %v2153_v10 }
 0x345   : > { %v642_v40 = vpop.f32.mrb[2].mxu0 }
 0x346   : > { %v643_v41 = vadd.f32 %v1702_v39, %v642_v40  ;;  %v1831_v42 = vpop.f32.mrb[3].mxu0  ;;  %v1714_v40 = vld [vmem:[%s2265_s11 + $0x28] sm:$0xff] }
 0x348   : > { %v646_v43 = vmax.f32 %v643_v41, 0.0 }
 0x34a   : > { %1841 = vmatmul.mubr.msk.f32.vlgmr.msra.gmra.mrb[2].mxu1 %vm412_vm1, %v646_v43 }
 0x34b   : > { %1996 = vmatpush3.bf16.msra.mxu1 %v2292_v16  ;;  %1862 = vmatprep.mubr.msk.f32.mxu1 %vm2154_vm0, %v2155_v13 }
 0x34c   : > { %1997 = vmatprep.subr.bf16.mxu1 %v2153_v10 }
 0x34f   : > { %1999 = vmatpush3.bf16.msra.mxu1 %v2326_v21 }
 0x350   : > { %2006 = vmatprep.subr.bf16.mxu1 %v2153_v10 }
 0x41d   : > { %v716_v44 = vpop.f32.mrb[2].mxu1 }
 0x41e   : > { %v717_v45 = vadd.f32 %v2341_v27, %v716_v44  ;;  %v1842_v46 = vpop.f32.mrb[3].mxu1 }
 0x420   : > { %2097 = vtanh.f32 %v717_v45 }
 0x42a   : > { %v2098_v47 = vpop.eup %2097 }
 0x42b   : > { %v722_v48 = vadd.f32 1.0, %v2098_v47  ;;  %v721_v50 = vmul.f32 %v2098_v47, %v2348_v35 }
 0x42d   : > { %v723_v49 = vmul.f32 %v722_v48, %v2344_v32 }
 0x42f   : > { %725 = vrot.lane.b32.xlu0 %v723_v49, %s2156_s27 }
 0x4a1   : > { %v726_v51 = vpop.permute.xlu0 %725 }
 0x4a2   : > { %v728_v52 = vadd.f32 %v726_v51, %v721_v50 }
 0x4a4   : > { %1852 = vmatmul.mubr.msk.f32.vlgmr.msra.gmra.mrb[4].mxu0 %vm412_vm1, %v728_v52 }
 0x4a5   : > { %2002 = vmatpush3.bf16.msra.mxu0 %v2277_v11  ;;  %1873 = vmatprep.mubr.msk.f32.mxu0 %vm2154_vm0, %v2155_v13 }
 0x4a6   : > { %2003 = vmatprep.subr.bf16.mxu0 %v2153_v10 }
 0x4a9   : > { %2005 = vmatpush3.bf16.msra.mxu0 %v2297_v17 }
 0x4aa   : > { %2012 = vmatprep.subr.bf16.mxu0 %v2153_v10 }
 0x577   : > { %v800_v54 = vpop.f32.mrb[4].mxu0 }
 0x578   : > { %v801_v55 = vadd.f32 %v1705_v53, %v800_v54  ;;  %v1853_v56 = vpop.f32.mrb[5].mxu0 }
 0x579   : > { %v1520_v56 = vld [vmem:[%s2492_s6 + $0x8] sm:$0xff] }
 0x57a   : > { %v804_v57 = vmax.f32 %v801_v55, 0.0  ;;  %v1519_v55 = vld [vmem:[%s2492_s6] sm:$0xff] }
 0x57c   : > { %1863 = vmatmul.mubr.msk.f32.vlgmr.msra.gmra.mrb[4].mxu1 %vm412_vm1, %v804_v57  ;;  %v1521_v57 = vld [vmem:[%s2492_s6 + $0x10] sm:$0xff] }
 0x57d   : > { %2008 = vmatpush3.bf16.msra.mxu1 %v2292_v16  ;;  %1884 = vmatprep.mubr.msk.f32.mxu1 %vm2154_vm0, %v2155_v13 }
 0x57e   : > { %2009 = vmatprep.subr.bf16.mxu1 %v2153_v10 }
 0x581   : > { %2011 = vmatpush3.bf16.msra.mxu1 %v2326_v21 }
 0x582   : > { %2018 = vmatprep.subr.bf16.mxu1 %v2153_v10 }
 0x64f   : > { %v874_v58 = vpop.f32.mrb[4].mxu1 }
 0x650   : > { %v875_v59 = vadd.f32 %v2341_v27, %v874_v58  ;;  %v1864_v60 = vpop.f32.mrb[5].mxu1  ;;  %v1522_v58 = vld [vmem:[%s2492_s6 + $0x18] sm:$0xff] }
 0x652   : > { %2099 = vtanh.f32 %v875_v59  ;;  %v2052_v59 = vpack.c.bf16 %v1522_v58, %v1521_v57 }
 0x65c   : > { %v2100_v61 = vpop.eup %2099 }
 0x65d   : > { %v880_v62 = vadd.f32 1.0, %v2100_v61  ;;  %v879_v0 = vmul.f32 %v2100_v61, %v2348_v35 }
 0x65f   : > { %v881_v63 = vmul.f32 %v880_v62, %v2344_v32 }
 0x661   : > { %883 = vrot.lane.b32.xlu1 %v881_v63, %s2156_s27 }
 0x6d3   : > { %v884_v1 = vpop.permute.xlu1 %883 }
 0x6d4   : > { %v886_v2 = vadd.f32 %v884_v1, %v879_v0 }
 0x6d6   : > { %1874 = vmatmul.mubr.msk.f32.vlgmr.msra.gmra.mrb[6].mxu0 %vm412_vm1, %v886_v2 }
 0x6d7   : > { %2014 = vmatpush3.bf16.msra.mxu0 %v2277_v11  ;;  %1895 = vmatprep.mubr.msk.f32.mxu0 %vm2154_vm0, %v2155_v13 }
 0x6d8   : > { %2015 = vmatprep.subr.bf16.mxu0 %v2153_v10 }
 0x6db   : > { %2017 = vmatpush3.bf16.msra.mxu0 %v2297_v17 }
 0x6dc   : > { %2024 = vmatprep.subr.bf16.mxu0 %v2153_v10 }
 0x7a9   : > { %v958_v4 = vpop.f32.mrb[6].mxu0 }
 0x7aa   : > { %v959_v5 = vadd.f32 %v1708_v3, %v958_v4  ;;  %v1875_v6 = vpop.f32.mrb[7].mxu0 }
 0x7ac   : > { %v962_v7 = vmax.f32 %v959_v5, 0.0 }
 0x7ae   : > { %1885 = vmatmul.mubr.msk.f32.vlgmr.msra.gmra.mrb[6].mxu1 %vm412_vm1, %v962_v7 }
 0x7af   : > { %2020 = vmatpush3.bf16.msra.mxu1 %v2292_v16  ;;  %1906 = vmatprep.mubr.msk.f32.mxu1 %vm2154_vm0, %v2155_v13 }
 0x7b0   : > { %2021 = vmatprep.subr.bf16.mxu1 %v2153_v10 }
 0x7b3   : > { %2023 = vmatpush3.bf16.msra.mxu1 %v2326_v21 }
 0x7b4   : > { %2030 = vmatprep.subr.bf16.mxu1 %v2153_v10 }
 0x881   : > { %v1032_v8 = vpop.f32.mrb[6].mxu1 }
 0x882   : > { %v1033_v9 = vadd.f32 %v2341_v27, %v1032_v8  ;;  %v1886_v12 = vpop.f32.mrb[7].mxu1 }
 0x884   : > { %2101 = vtanh.f32 %v1033_v9 }
 0x88e   : > { %v2102_v14 = vpop.eup %2101 }
 0x88f   : > { %v1038_v15 = vadd.f32 1.0, %v2102_v14  ;;  %v1037_v19 = vmul.f32 %v2102_v14, %v2348_v35 }
 0x891   : > { %v1039_v18 = vmul.f32 %v1038_v15, %v2344_v32 }
 0x893   : > { %1041 = vrot.lane.b32.xlu1 %v1039_v18, %s2156_s27 }
 0x905   : > { %v1042_v20 = vpop.permute.xlu1 %1041 }
 0x906   : > { %v1044_v22 = vadd.f32 %v1042_v20, %v1037_v19 }
 0x908   : > { %1896 = vmatmul.mubr.msk.f32.vlgmr.msra.gmra.mrb[8].mxu0 %vm412_vm1, %v1044_v22 }
 0x909   : > { %2026 = vmatpush3.bf16.msra.mxu0 %v2277_v11  ;;  %1917 = vmatprep.mubr.msk.f32.mxu0 %vm2154_vm0, %v2155_v13 }
 0x90a   : > { %2027 = vmatprep.subr.bf16.mxu0 %v2153_v10 }
 0x90d   : > { %2029 = vmatpush3.bf16.msra.mxu0 %v2297_v17 }
 0x90e   : > { %2036 = vmatprep.subr.bf16.mxu0 %v2153_v10 }
 0x9db   : > { %v1116_v24 = vpop.f32.mrb[8].mxu0 }
 0x9dc   : > { %v1117_v25 = vadd.f32 %v1711_v23, %v1116_v24  ;;  %v1897_v26 = vpop.f32.mrb[9].mxu0 }
 0x9de   : > { %v1120_v28 = vmax.f32 %v1117_v25, 0.0 }
 0x9e0   : > { %1907 = vmatmul.mubr.msk.f32.vlgmr.msra.gmra.mrb[8].mxu1 %vm412_vm1, %v1120_v28 }
 0x9e1   : > { %2032 = vmatpush3.bf16.msra.mxu1 %v2292_v16  ;;  %1928 = vmatprep.mubr.msk.f32.mxu1 %vm2154_vm0, %v2155_v13 }
 0x9e2   : > { %2033 = vmatprep.subr.bf16.mxu1 %v2153_v10 }
 0x9e5   : > { %2035 = vmatpush3.bf16.msra.mxu1 %v2326_v21 }
 0x9e6   : > { %2042 = vmatprep.subr.bf16.mxu1 %v2153_v10 }
 0xab3   : > { %v1190_v29 = vpop.f32.mrb[8].mxu1 }
 0xab4   : > { %v1191_v30 = vadd.f32 %v2341_v27, %v1190_v29  ;;  %v1908_v31 = vpop.f32.mrb[9].mxu1 }
 0xab6   : > { %2103 = vtanh.f32 %v1191_v30 }
 0xac0   : > { %v2104_v33 = vpop.eup %2103 }
 0xac1   : > { %v1196_v34 = vadd.f32 1.0, %v2104_v33  ;;  %v1195_v37 = vmul.f32 %v2104_v33, %v2348_v35 }
 0xac3   : > { %v1197_v36 = vmul.f32 %v1196_v34, %v2344_v32 }
 0xac5   : > { %1199 = vrot.lane.b32.xlu0 %v1197_v36, %s2156_s27 }
 0xb37   : > { %v1200_v38 = vpop.permute.xlu0 %1199 }
 0xb38   : > { %v1202_v39 = vadd.f32 %v1200_v38, %v1195_v37 }
 0xb3a   : > { %1918 = vmatmul.mubr.msk.f32.vlgmr.msra.gmra.mrb[10].mxu0 %vm412_vm1, %v1202_v39 }
 0xb3b   : > { %2038 = vmatpush3.bf16.msra.mxu0 %v2277_v11  ;;  %1939 = vmatprep.mubr.msk.f32.mxu0 %vm2154_vm0, %v2155_v13 }
 0xb3c   : > { %2039 = vmatprep.subr.bf16.mxu0 %v2153_v10 }
 0xb3f   : > { %2041 = vmatpush3.bf16.msra.mxu0 %v2297_v17 }
 0xb40   : > { %2048 = vmatprep.subr.bf16.mxu0 %v2153_v10 }
 0xc0d   : > { %v1274_v41 = vpop.f32.mrb[10].mxu0 }
 0xc0e   : > { %v1275_v42 = vadd.f32 %v1714_v40, %v1274_v41  ;;  %v1919_v43 = vpop.f32.mrb[11].mxu0 }
 0xc10   : > { %v1278_v44 = vmax.f32 %v1275_v42, 0.0 }
 0xc12   : > { %1929 = vmatmul.mubr.msk.f32.vlgmr.msra.gmra.mrb[10].mxu1 %vm412_vm1, %v1278_v44 }
 0xc13   : > { %2044 = vmatpush3.bf16.msra.mxu1 %v2292_v16  ;;  %1950 = vmatprep.mubr.msk.f32.mxu1 %vm2154_vm0, %v2155_v13 }
 0xc14   : > { %2045 = vmatprep.subr.bf16.mxu1 %v2153_v10 }
 0xc17   : > { %2047 = vmatpush3.bf16.msra.mxu1 %v2326_v21  ;;  %v1717_v21 = vld [vmem:[%s2265_s11 + $0x30] sm:$0xff] }
 0xce5   : > { %v1348_v11 = vpop.f32.mrb[10].mxu1 }
 0xce6   : > { %v1349_v17 = vadd.f32 %v2341_v27, %v1348_v11  ;;  %v1930_v45 = vpop.f32.mrb[11].mxu1 }
 0xce8   : > { %2105 = vtanh.f32 %v1349_v17 }
 0xcf2   : > { %v2106_v46 = vpop.eup %2105 }
 0xcf3   : > { %v1354_v47 = vadd.f32 1.0, %v2106_v46  ;;  %v1353_v16 = vmul.f32 %v2106_v46, %v2348_v35 }
 0xcf5   : > { %v1355_v48 = vmul.f32 %v1354_v47, %v2344_v32 }
 0xcf7   : > { %1357 = vrot.lane.b32.xlu1 %v1355_v48, %s2156_s27 }
 0xd69   : > { %v1358_v49 = vpop.permute.xlu1 %1357 }
 0xd6a   : > { %v1360_v50 = vadd.f32 %v1358_v49, %v1353_v16 }
 0xd6c   : > { %1940 = vmatmul.mubr.msk.f32.vlgmr.msra.gmra.mrb[12].mxu0 %vm412_vm1, %v1360_v50 }
 0xd6d   : > { %1961 = vmatprep.mubr.msk.f32.mxu0 %vm2154_vm0, %v2155_v13  ;;  %v2049_v13 = vpack.c.bf16 %v1520_v56, %v1519_v55 }
 0xd6f   : > { %2050 = vmatpush3.bf16.msra.mxu0 %v2049_v13 }
 0xd70   : > { %2051 = vmatprep.subr.bf16.mxu0 %v2153_v10  ;;  %v1720_v10 = vld [vmem:[%s2493_s7] ss:$0 sm:$0xff] }
 0xd73   : > { %2053 = vmatpush3.bf16.msra.mxu0 %v2052_v59 }
 0xe3f   : > { %v1432_v51 = vpop.f32.mrb[12].mxu0 }
 0xe40   : > { %v1433_v52 = vadd.f32 %v1717_v21, %v1432_v51  ;;  %v1941_v53 = vpop.f32.mrb[13].mxu0 }
 0xe42   : > { %v1436_v54 = vmax.f32 %v1433_v52, 0.0 }
 0xe44   : > { %1951 = vmatmul.mubr.msk.f32.vlgmr.msra.gmra.mrb[12].mxu1 %vm412_vm1, %v1436_v54 }
 0xf17   : > { %v1506_v60 = vpop.f32.mrb[12].mxu1 }
 0xf18   : > { %v1507_v61 = vadd.f32 %v2341_v27, %v1506_v60  ;;  %v1952_v62 = vpop.f32.mrb[13].mxu1 }
 0xf1a   : > { %2107 = vtanh.f32 %v1507_v61 }
 0xf24   : > { %v2108_v63 = vpop.eup %2107 }
 0xf25   : > { %v1512_v0 = vadd.f32 1.0, %v2108_v63  ;;  %v1511_v2 = vmul.f32 %v2108_v63, %v2348_v35 }
 0xf27   : > { %v1513_v1 = vmul.f32 %v1512_v0, %v2344_v32 }
 0xf29   : > { %1515 = vrot.lane.b32.xlu0 %v1513_v1, %s2156_s27 }
 0xf9b   : > { %v1516_v3 = vpop.permute.xlu0 %1515 }
 0xf9c   : > { %v1518_v4 = vadd.f32 %v1516_v3, %v1511_v2 }
 0xf9e   : > { %1962 = vmatmul.mubr.msk.f32.vlgmr.msra.gmra.mrb[14].mxu0 %vm412_vm1, %v1518_v4 }
0x1071   : > { %v1599_v27 = vpop.f32.mrb[14].mxu0 }
0x1072   : > { %v1600_v32 = vadd.f32 %v1720_v10, %v1599_v27  ;;  %v1963_v5 = vpop.f32.mrb[15].mxu0 }
0x1074   : > { %1604 = vst.msk [vmem:[%s392_s14] sm:$0xff] %vm1603_vm2, %v1600_v32 }
0x1075 PF: > { %p16_p6 = scmp.ge.s32.totalorder %s2221_s9, 4   ;;  %s2497_s27 = smov %s2146_s28 }
0x1076   : > { %s2498_s28 = smov %s2231_s12  ;;  %s2499_s29 = smov %s2221_s9 }
0x1077   :  { %18 = sbr.rel (!%p16_p6) target bundleno = 2 (0x2), region = 139 }
0x107e   :  { %1624 = vsyncpa [#allocation3], 1 }
0x107f   :  { %1626 = vsyncpa [#allocation3 + $0x1], 1 }

</bundles_post_ra>
